<compile_context>
chip_gen: v6e
topology: v6e:2x2x1
jax: 0.10.0
libtpu: 0.0.40
codegen_flags: <defaults>
</compile_context>

<pallas_src>
import functools

import jax
import jax.numpy as jnp
from jax.experimental import pallas as pl
from jax.experimental.pallas import tpu as pltpu


def _scatter_linear_kernel(batch_ref, x_ref, w_ref, b_ref, o_ref,
                           acc_ref, cnt_ref, *, scatter):
    k = pl.program_id(0)

    @pl.when(k == 0)
    def _init():
        acc_ref[...] = jnp.zeros_like(acc_ref)
        cnt_ref[...] = jnp.zeros_like(cnt_ref)

    batch = batch_ref[...]                          # (1, TILE_N) int32, -1 = padding
    x = x_ref[...]                                  # (TILE_N, D)
    n_graphs = acc_ref.shape[0]
    tile_n = batch.shape[1]

    seg_ids = jax.lax.broadcasted_iota(jnp.int32, (n_graphs, tile_n), 0)  # (B, TILE_N)
    one_hot = (batch == seg_ids).astype(x.dtype)                          # (B, TILE_N)

    # scatter_add partial sum via MXU: (B, TILE_N) @ (TILE_N, D) -> (B, D), f32 acc
    acc_ref[...] += jnp.dot(one_hot, x, preferred_element_type=jnp.float32)

    if scatter == "mean":
        cnt_ref[...] += jnp.sum(one_hot.astype(jnp.float32), axis=1, keepdims=True)
    # TODO(synk): scatter == "max" (segment-max) not implemented; 'add' is the module default.

    @pl.when(k == pl.num_programs(0) - 1)
    def _finalize():
        pooled = acc_ref[...]                       # (B, D) f32
        if scatter == "mean":
            pooled = pooled * pl.reciprocal(
                jnp.maximum(cnt_ref[...], 1.0), approx=False)
        # linear: contract pooled dim 1 (D) with weight dim 1 (D); weight stays (O, D),
        # so no transpose is materialized anywhere.
        out = jax.lax.dot_general(
            pooled, w_ref[...].astype(jnp.float32),
            dimension_numbers=(((1,), (1,)), ((), ())),
            preferred_element_type=jnp.float32) + b_ref[...].astype(jnp.float32)
        o_ref[...] = out.astype(o_ref.dtype)


def simple_linear_model(x, batch, weight, bias, num_graphs,
                        scatter="add", tile_n=2048):
    """x: [N, input_dim], batch: [N] int32 graph ids in [0, num_graphs),
    weight: [output_dim, input_dim], bias: [output_dim].
    Returns [num_graphs, output_dim] f32."""
    n_nodes, input_dim = x.shape
    output_dim = weight.shape[0]

    # Lane-friendly node tile: multiple of 128, no bigger than needed.
    tile_n = max(128, min(tile_n, 128 * pl.cdiv(n_nodes, 128)))
    n_pad = tile_n * pl.cdiv(n_nodes, tile_n)
    pad = n_pad - n_nodes

    x_p = jnp.pad(x, ((0, pad), (0, 0))) if pad else x
    batch_p = jnp.pad(batch.astype(jnp.int32), (0, pad), constant_values=-1)
    batch2d = batch_p.reshape(1, n_pad)
    b2d = bias.reshape(1, output_dim)

    grid = (n_pad // tile_n,)
    kernel = functools.partial(_scatter_linear_kernel, scatter=scatter)

    itemsize = jnp.dtype(x.dtype).itemsize
    cost = pl.CostEstimate(
        flops=2 * num_graphs * n_pad * input_dim
              + 2 * num_graphs * input_dim * output_dim,
        transcendentals=0,
        bytes_accessed=n_pad * input_dim * itemsize + n_pad * 4
                       + weight.size * jnp.dtype(weight.dtype).itemsize
                       + bias.size * jnp.dtype(bias.dtype).itemsize
                       + num_graphs * output_dim * 4,
    )

    return pl.pallas_call(
        kernel,
        out_shape=jax.ShapeDtypeStruct((num_graphs, output_dim), jnp.float32),
        grid_spec=pltpu.PrefetchScalarGridSpec(
            num_scalar_prefetch=0,
            grid=grid,
            in_specs=[
                pl.BlockSpec((1, tile_n), lambda k: (0, k)),            # batch ids
                pl.BlockSpec((tile_n, input_dim), lambda k: (k, 0)),    # x tile (streamed)
                pl.BlockSpec((output_dim, input_dim), lambda k: (0, 0)),  # weight (resident)
                pl.BlockSpec((1, output_dim), lambda k: (0, 0)),        # bias
            ],
            out_specs=pl.BlockSpec((num_graphs, output_dim), lambda k: (0, 0)),
            scratch_shapes=[
                pltpu.VMEM((num_graphs, input_dim), jnp.float32),  # pooled accumulator
                pltpu.VMEM((num_graphs, 1), jnp.float32),          # counts (mean)
            ],
        ),
        compiler_params=pltpu.CompilerParams(
            dimension_semantics=("arbitrary",),     # reduction into resident accumulator
            vmem_limit_bytes=32 * 1024 * 1024,
        ),
        cost_estimate=cost,
    )(batch2d, x_p, weight, b2d)


if __name__ == "__main__":
    # Small shapes: 8 nodes, input_dim=32, output_dim=16, 2 graphs.
    N, INPUT_DIM, OUTPUT_DIM, NUM_GRAPHS = 8, 32, 16, 2

    key = jax.random.PRNGKey(0)
    kx, kw, kb = jax.random.split(key, 3)

    x = jax.random.normal(kx, (N, INPUT_DIM), dtype=jnp.float32)
    batch = jnp.array([0, 0, 0, 1, 1, 1, 1, 0], dtype=jnp.int32)

    # nn.Linear-style deterministic init: U(-1/sqrt(in), 1/sqrt(in))
    bound = 1.0 / (INPUT_DIM ** 0.5)
    weight = jax.random.uniform(kw, (OUTPUT_DIM, INPUT_DIM), jnp.float32, -bound, bound)
    bias = jax.random.uniform(kb, (OUTPUT_DIM,), jnp.float32, -bound, bound)

    out = simple_linear_model(x, batch, weight, bias, NUM_GRAPHS, scatter="add")
    out = jax.block_until_ready(out)

    # Reference check in plain JAX (scatter_add + linear).
    pooled_ref = jnp.zeros((NUM_GRAPHS, INPUT_DIM), jnp.float32).at[batch].add(x)
    ref = pooled_ref @ weight.T + bias
    assert out.shape == (NUM_GRAPHS, OUTPUT_DIM)
    assert jnp.allclose(out, ref, atol=1e-4, rtol=1e-4)

    # Also exercise the multi-tile path (grid > 1) and 'mean' with a larger N.
    N2 = 300
    x2 = jax.random.normal(kx, (N2, INPUT_DIM), dtype=jnp.float32)
    batch2 = (jnp.arange(N2, dtype=jnp.int32) * NUM_GRAPHS) // N2
    out2 = jax.block_until_ready(
        simple_linear_model(x2, batch2, weight, bias, NUM_GRAPHS,
                            scatter="mean", tile_n=128))
    pooled2 = jnp.zeros((NUM_GRAPHS, INPUT_DIM), jnp.float32).at[batch2].add(x2)
    cnt2 = jnp.zeros((NUM_GRAPHS, 1), jnp.float32).at[batch2].add(1.0)
    ref2 = (pooled2 / jnp.maximum(cnt2, 1.0)) @ weight.T + bias
    assert jnp.allclose(out2, ref2, atol=1e-4, rtol=1e-4)

    print("KERNEL_OK")
</pallas_src>

<mosaic_0001>
module attributes {stable_mosaic.version = 11 : i64} {
  func.func @_scatter_linear_kernel(%arg0: i32, %arg1: memref<1x128xi32, #tpu.memory_space<vmem>>, %arg2: memref<128x32xf32, #tpu.memory_space<vmem>>, %arg3: memref<16x32xf32, #tpu.memory_space<vmem>>, %arg4: memref<1x16xf32, #tpu.memory_space<vmem>>, %arg5: memref<2x16xf32, #tpu.memory_space<vmem>>, %arg6: memref<2x32xf32, #tpu.memory_space<vmem>>, %arg7: memref<2x1xf32, #tpu.memory_space<vmem>>) attributes {dimension_semantics = [#tpu.dimension_semantics<arbitrary>], iteration_bounds = array<i64: 1>, scalar_prefetch = 0 : i64, scratch_operands = 2 : i64, tpu.core_type = #tpu.core_type<tc>, window_params = [{transform_indices = @transform_0, window_bounds = array<i64: 1, 128>}, {transform_indices = @transform_1, window_bounds = array<i64: 128, 32>}, {pipeline_mode = #tpu.pipeline_mode<synchronous>, transform_indices = @transform_2, window_bounds = array<i64: 16, 32>}, {pipeline_mode = #tpu.pipeline_mode<synchronous>, transform_indices = @transform_3, window_bounds = array<i64: 1, 16>}, {pipeline_mode = #tpu.pipeline_mode<synchronous>, transform_indices = @transform_4, window_bounds = array<i64: 2, 16>}]} {
    %c0_i32 = arith.constant 0 : i32
    %0 = arith.cmpi eq, %arg0, %c0_i32 : i32
    %1 = arith.extui %0 : i1 to i32
    %c0_i32_0 = arith.constant 0 : i32
    %2 = arith.cmpi ne, %1, %c0_i32_0 : i32
    scf.if %2 {
      %cst_10 = arith.constant 0.000000e+00 : f32
      %17 = vector.broadcast %cst_10 : f32 to vector<2x32xf32>
      %c0_11 = arith.constant 0 : index
      %c0_12 = arith.constant 0 : index
      %18 = vector.load %arg6[%c0_11, %c0_12] : memref<2x32xf32, #tpu.memory_space<vmem>>, vector<2x32xf32>
      tpu.vector_store %arg6[%c0_11, %c0_12], %17 {strides = array<i32>} : memref<2x32xf32, #tpu.memory_space<vmem>>, vector<2x32xf32>,
      %cst_13 = arith.constant 0.000000e+00 : f32
      %19 = vector.broadcast %cst_13 : f32 to vector<2x1xf32>
      %c0_14 = arith.constant 0 : index
      %c0_15 = arith.constant 0 : index
      %20 = vector.load %arg7[%c0_14, %c0_15] : memref<2x1xf32, #tpu.memory_space<vmem>>, vector<2x1xf32>
      tpu.vector_store %arg7[%c0_14, %c0_15], %19 {strides = array<i32>} : memref<2x1xf32, #tpu.memory_space<vmem>>, vector<2x1xf32>,
    } else {
    }
    %c0 = arith.constant 0 : index
    %c0_1 = arith.constant 0 : index
    %3 = vector.load %arg1[%c0, %c0_1] : memref<1x128xi32, #tpu.memory_space<vmem>>, vector<1x128xi32>
    %c0_2 = arith.constant 0 : index
    %c0_3 = arith.constant 0 : index
    %4 = vector.load %arg2[%c0_2, %c0_3] : memref<128x32xf32, #tpu.memory_space<vmem>>, vector<128x32xf32>
    %5 = tpu.iota {dimensions = array<i32: 0>} : vector<2x128xi32>
    %6 = vector.broadcast %3 : vector<1x128xi32> to vector<2x128xi32>
    %7 = arith.cmpi eq, %6, %5 : vector<2x128xi32>
    %8 = arith.extui %7 : vector<2x128xi1> to vector<2x128xi32>
    %9 = arith.sitofp %8 : vector<2x128xi32> to vector<2x128xf32>
    %c0_4 = arith.constant 0 : index
    %c0_5 = arith.constant 0 : index
    %10 = vector.load %arg6[%c0_4, %c0_5] : memref<2x32xf32, #tpu.memory_space<vmem>>, vector<2x32xf32>
    %cst = arith.constant dense<0.000000e+00> : vector<2x32xf32>
    %11 = tpu.matmul %9, %4, %cst {dimension_numbers = #tpu.dot_dimension_numbers<[1], [0], [0], [1], [0, 0, 1, 1], [], []>} : vector<2x128xf32>, vector<128x32xf32>, vector<2x32xf32> -> vector<2x32xf32>
    %12 = arith.addf %10, %11 : vector<2x32xf32>
    %c0_6 = arith.constant 0 : index
    %c0_7 = arith.constant 0 : index
    %13 = vector.load %arg6[%c0_6, %c0_7] : memref<2x32xf32, #tpu.memory_space<vmem>>, vector<2x32xf32>
    tpu.vector_store %arg6[%c0_6, %c0_7], %12 {strides = array<i32>} : memref<2x32xf32, #tpu.memory_space<vmem>>, vector<2x32xf32>,
    %c0_i32_8 = arith.constant 0 : i32
    %14 = arith.cmpi eq, %arg0, %c0_i32_8 : i32
    %15 = arith.extui %14 : i1 to i32
    %c0_i32_9 = arith.constant 0 : i32
    %16 = arith.cmpi ne, %15, %c0_i32_9 : i32
    scf.if %16 {
      %c0_10 = arith.constant 0 : index
      %c0_11 = arith.constant 0 : index
      %17 = vector.load %arg6[%c0_10, %c0_11] : memref<2x32xf32, #tpu.memory_space<vmem>>, vector<2x32xf32>
      %c0_12 = arith.constant 0 : index
      %c0_13 = arith.constant 0 : index
      %18 = vector.load %arg3[%c0_12, %c0_13] : memref<16x32xf32, #tpu.memory_space<vmem>>, vector<16x32xf32>
      %cst_14 = arith.constant dense<0.000000e+00> : vector<2x16xf32>
      %19 = tpu.matmul %17, %18, %cst_14 {dimension_numbers = #tpu.dot_dimension_numbers<[1], [1], [0], [0], [0, 0, 1, 0], [], []>} : vector<2x32xf32>, vector<16x32xf32>, vector<2x16xf32> -> vector<2x16xf32>
      %c0_15 = arith.constant 0 : index
      %c0_16 = arith.constant 0 : index
      %20 = vector.load %arg4[%c0_15, %c0_16] : memref<1x16xf32, #tpu.memory_space<vmem>>, vector<1x16xf32>
      %21 = vector.broadcast %20 : vector<1x16xf32> to vector<2x16xf32>
      %22 = arith.addf %19, %21 : vector<2x16xf32>
      %c0_17 = arith.constant 0 : index
      %c0_18 = arith.constant 0 : index
      %23 = vector.load %arg5[%c0_17, %c0_18] : memref<2x16xf32, #tpu.memory_space<vmem>>, vector<2x16xf32>
      tpu.vector_store %arg5[%c0_17, %c0_18], %22 {strides = array<i32>} : memref<2x16xf32, #tpu.memory_space<vmem>>, vector<2x16xf32>,
    } else {
    }
    return
  }
  func.func @transform_0(%arg0: i32) -> (i32, i32) {
    %c0_i32 = arith.constant 0 : i32
    %c0_i32_0 = arith.constant 0 : i32
    return %c0_i32, %arg0 : i32, i32
  }
  func.func @transform_1(%arg0: i32) -> (i32, i32) {
    %c0_i32 = arith.constant 0 : i32
    %c0_i32_0 = arith.constant 0 : i32
    return %arg0, %c0_i32 : i32, i32
  }
  func.func @transform_2(%arg0: i32) -> (i32, i32) {
    %c0_i32 = arith.constant 0 : i32
    %c0_i32_0 = arith.constant 0 : i32
    %c0_i32_1 = arith.constant 0 : i32
    return %c0_i32, %c0_i32_0 : i32, i32
  }
  func.func @transform_3(%arg0: i32) -> (i32, i32) {
    %c0_i32 = arith.constant 0 : i32
    %c0_i32_0 = arith.constant 0 : i32
    %c0_i32_1 = arith.constant 0 : i32
    return %c0_i32, %c0_i32_0 : i32, i32
  }
  func.func @transform_4(%arg0: i32) -> (i32, i32) {
    %c0_i32 = arith.constant 0 : i32
    %c0_i32_0 = arith.constant 0 : i32
    %c0_i32_1 = arith.constant 0 : i32
    return %c0_i32, %c0_i32_0 : i32, i32
  }
}

</mosaic_0001>

<bundles_post_ra>
// kernel: tpu_custom_call.1
= control target key start
LH: loop header
LB: loop body
LE: loop exit
PB: predicated region body
PF: predicated region fallthrough
CT: control target
= control target key end

     0   :  { %v330_v1 = vmov 0.0   ;;  %vm331_vm0 = vmmov 0   ;;  %vm22_vm1 = vcmask 254976   ;;  %s445_s0 = inlined_call_operand.vmem [shape: s32[1,128], index: 0, kind: input, shape index: {}]   ;;  %s446_s1 = inlined_call_operand.vmem [shape: f32[128,32], index: 1, kind: input, shape index: {}]   ;;  %s447_s2 = inlined_call_operand.vmem [shape: f32[16,32], index: 2, kind: input, shape index: {}]   ;;  %s448_s3 = inlined_call_operand.vmem [shape: f32[1,16], index: 3, kind: input, shape index: {}]   ;;  %s449_s4 = inlined_call_operand.hbm [shape: f32[2,16], index: 4, kind: output, shape index: {}]  }
   0x1   :  { %v42_v0 = vld [vmem:[%s446_s1 + $0x78] sm:$0xff]  ;;  %262 = vmatprep.subr.mxu0 %v330_v1  ;;  %v41_v2 = vld [vmem:[%s446_s1 + $0x70] sm:$0xff]  ;;  %294 = vmatprep.mubr.msk.f32.mxu0 %vm331_vm0, %v330_v1  ;;  %23 = vst.msk [vmem:[#allocation2] sm:$0x3] %vm22_vm1, %v330_v1  ;;  %v40_v3 = vld [vmem:[%s446_s1 + $0x68] sm:$0xff] }
   0x2   :  { %263 = vmatpush3.msra.mxu0 %v42_v0  ;;  %297 = vmatprep.subr.mxu1 %v330_v1  ;;  %v39_v4 = vld [vmem:[%s446_s1 + $0x60] sm:$0xff] }
   0x3   :  { %264 = vmatprep.subr.mxu0 %v330_v1  ;;  %301 = vmatprep.mubr.msk.f32.mxu1 %vm331_vm0, %v330_v1 }
   0x4   :  { %265 = vmatpush3.msra.mxu0 %v41_v2 }
   0x5   :  { %266 = vmatprep.subr.mxu0 %v330_v1 }
   0x6   :  { %9 = vsyncpa [#allocation5], 0  ;;  %267 = vmatpush3.msra.mxu0 %v40_v3  ;;  %v38_v5 = vld [vmem:[%s446_s1 + $0x58] sm:$0xff]  ;;  %v37_v6 = vld [vmem:[%s446_s1 + $0x50] sm:$0xff]  ;;  %v43_v13 = vlaneseq  ;;  %v332_v20 = vmov 1.0   ;;  %vm139_vm3 = vcmask 261120  }
   0x7   :  { %268 = vmatprep.subr.mxu0 %v330_v1  ;;  %v36_v7 = vld [vmem:[%s446_s1 + $0x48] sm:$0xff]  ;;  %v35_v8 = vld [vmem:[%s446_s1 + $0x40] sm:$0xff]  ;;  %v34_v9 = vld [vmem:[%s446_s1 + $0x38] sm:$0xff]  ;;  %s333_s27 = smov [#allocation4]   ;;  %vm219_vm4 = vcmask 123904  }
   0x8   :  { %269 = vmatpush3.msra.mxu0 %v39_v4  ;;  %v33_v10 = vld [vmem:[%s446_s1 + $0x30] sm:$0xff]  ;;  %v32_v11 = vld [vmem:[%s446_s1 + $0x28] sm:$0xff]  ;;  %v31_v12 = vld [vmem:[%s446_s1 + $0x20] sm:$0xff]  ;;  %v44_v16 = vshrl.u32 %v43_v13, 7  ;;  %s227_s28 = sshll.u32 %s333_s27, 4  ;;  %s228_s28 = int_to_ptr.vmem [resolvable:$true] %s227_s28 }
   0x9   :  { %270 = vmatprep.subr.mxu0 %v330_v1  ;;  %v30_v14 = vld [vmem:[%s446_s1 + $0x18] sm:$0xff]  ;;  %v29_v15 = vld [vmem:[%s446_s1 + $0x10] sm:$0xff]  ;;  %v28_v17 = vld [vmem:[%s446_s1 + $0x8] sm:$0xff]  ;;  %p313_p1 = scmp.lt.s32.totalorder %s228_s28, %s228_s28 }
   0xa   :  { %271 = vmatpush3.msra.mxu0 %v38_v5  ;;  %v235_v18 = vld [vmem:[%s445_s0] ss:$0 sm:$0xff]  ;;  %v131_v21 = vld [vmem:[%s447_s2 + $0x8] sm:$0xff] }
   0xb   :  { %272 = vmatprep.subr.mxu0 %v330_v1  ;;  %v27_v19 = vld [vmem:[%s446_s1] sm:$0xff]  ;;  %vm49_vm2 = vcmp.eq.s32.totalorder %v235_v18, %v44_v16  ;;  %298 = vmatpush3.xpose.msk.msra.mxu1 %vm139_vm3, %v131_v21 }
   0xc   :  { %273 = vmatpush3.msra.mxu0 %v37_v6  ;;  %299 = vmatprep.subr.mxu1 %v330_v1  ;;  %v130_v22 = vld [vmem:[%s447_s2] sm:$0xff]  ;;  %s308_s2 = scalar_lea.vmem %s228_s28, 32 }
   0xd   :  { %274 = vmatprep.subr.mxu0 %v330_v1  ;;  %v52_v23 = vld [vmem:[#allocation2] sm:$0x3]  ;;  %p309_p0 = scmp.ne.s32.totalorder %s228_s28, %s308_s2  ;;  %p314_p2 = scmp.lt.s32.totalorder %s308_s2, %s308_s2 }
   0xe   :  { %275 = vmatpush3.msra.mxu0 %v36_v7  ;;  %v238_v28 = vld [vmem:[%s448_s3] ss:$0 sm:$0xff] }
   0xf   :  { %276 = vmatprep.subr.mxu0 %v330_v1  ;;  %300 = vmatpush3.xpose.msk.msra.mxu1 %vm139_vm3, %v130_v22  ;;  %p315_p3 = por %p314_p2, %p313_p1 }
  0x10   :  { %277 = vmatpush3.msra.mxu0 %v35_v8 }
  0x11   :  { %278 = vmatprep.subr.mxu0 %v330_v1  ;;  %p316_p4 = pnand %p315_p3, %p309_p0 }
  0x12   :  { %279 = vmatpush3.msra.mxu0 %v34_v9 }
  0x13   :  { %280 = vmatprep.subr.mxu0 %v330_v1 }
  0x14   :  { %281 = vmatpush3.msra.mxu0 %v33_v10 }
  0x15   :  { %282 = vmatprep.subr.mxu0 %v330_v1 }
  0x16   :  { %283 = vmatpush3.msra.mxu0 %v32_v11 }
  0x17   :  { %284 = vmatprep.subr.mxu0 %v330_v1 }
  0x18   :  { %285 = vmatpush3.msra.mxu0 %v31_v12 }
  0x19   :  { %286 = vmatprep.subr.mxu0 %v330_v1 }
  0x1a   :  { %287 = vmatpush3.msra.mxu0 %v30_v14 }
  0x1b   :  { %288 = vmatprep.subr.mxu0 %v330_v1 }
  0x1c   :  { %289 = vmatpush3.msra.mxu0 %v29_v15 }
  0x1d   :  { %290 = vmatprep.subr.mxu0 %v330_v1 }
  0x1e   :  { %291 = vmatpush3.msra.mxu0 %v28_v17 }
  0x1f   :  { %292 = vmatprep.subr.mxu0 %v330_v1 }
  0x20   :  { %293 = vmatpush3.msra.mxu0 %v27_v19 }
  0x21   :  { %295 = vmatmul.mubr.msk.f32.vlgmr.msra.gmra.mxu0 %vm49_vm2, %v332_v20 }
  0xe1   :  { %v119_v24 = vpop.f32.mrf.mxu0 }
  0xe2   :  { %v123_v25 = vadd.f32 %v119_v24, %v52_v23 }
  0xe3   :  { %v296_v26 = vpop.f32.mrf.mxu0 }
  0xe4   :  { %125 = vst.msk [vmem:[#allocation2] sm:$0x3] %vm22_vm1, %v123_v25 }
  0xeb   :  { %v129_v27 = vld [vmem:[#allocation2] sm:$0x3] }
  0xec   :  { %302 = vmatmul.mubr.msk.f32.vlgmr.msra.gmra.mxu1 %vm139_vm3, %v129_v27 }
 0x1ac   :  { %v215_v29 = vpop.f32.mrf.mxu1 }
 0x1ad   :  { %v216_v30 = vadd.f32 %v238_v28, %v215_v29 }
 0x1ae   :  { %v303_v31 = vpop.f32.mrf.mxu1 }
 0x1af   :  { %220 = vst.msk [vmem:[#allocation4] sm:$0x3] %vm219_vm4, %v216_v30 }
 0x1b0   :  { %319 = shalt.err (!%p316_p4)
}
 0x1b1   :  { %230 = dma.vmem_to_hbm [thread:$0]  %s228_s28, 32, %s449_s4, [#allocation5]  }
 0x1b2   :  { %328 = dma.done.wait [#allocation5], 32  }
 0x1b3   :  { %329 = vsyncadd [#allocation5], 4294967264 }
 0x1b4   :  { %234 = vsyncpa [#allocation5], 1 }

</bundles_post_ra>
